<compile_context>
chip_gen: v7x
topology: tpu7x:2x2x1
jax: 0.10.0
libtpu: 0.0.40
codegen_flags: <defaults>
</compile_context>

<pallas_src>
import math

import jax
import jax.numpy as jnp
from jax.experimental import pallas as pl
from jax.experimental.pallas import tpu as pltpu


# ---------------------------------------------------------------------------
# Kernel: fused [gather -> Linear -> Swish -> Linear] for one batch tile.
# ---------------------------------------------------------------------------
def _time_embedding_kernel(t_ref, table_ref, w1_ref, b1_ref, w2_ref, b2_ref,
                           o_ref):
    TB = t_ref.shape[0]          # batch tile
    T = table_ref.shape[0]       # number of timesteps

    # ---- fused embedding-table gather (one-hot @ table on the MXU) -------
    idx = t_ref[...]                                            # (TB, 1) i32
    cols = jax.lax.broadcasted_iota(jnp.int32, (TB, T), 1)      # (TB, T)
    onehot = (idx == cols).astype(jnp.bfloat16)                 # (TB, T)
    x = jnp.dot(onehot, table_ref[...],
                preferred_element_type=jnp.float32)             # (TB, d_model)
    # exactly bf16(table[t]) values in an f32 container -> lossless cast
    x = x.astype(jnp.bfloat16)

    # ---- Linear(d_model, dim) + Swish (bias/Swish in f32) -----------------
    h = jnp.dot(x, w1_ref[...], preferred_element_type=jnp.float32)
    h = h + b1_ref[...]
    h = h * jax.nn.sigmoid(h)                                   # Swish (EUP+VPU)

    # ---- Linear(dim, dim) --------------------------------------------------
    o = jnp.dot(h.astype(jnp.bfloat16), w2_ref[...],
                preferred_element_type=jnp.float32)
    o = o + b2_ref[...]
    o_ref[...] = o.astype(o_ref.dtype)


def time_embedding_forward(t, table_bf16, w1_bf16, b1, w2_bf16, b2,
                           *, block_b=128):
    """t: int32 [B]; returns float32 [B, dim]."""
    B = t.shape[0]
    T, d_model = table_bf16.shape
    dim = w1_bf16.shape[1]

    # Batch tiling: single tile for small B, else 128-row tiles (padded).
    if B <= block_b:
        TB, B_pad = B, B
    else:
        TB = block_b
        B_pad = pl.cdiv(B, TB) * TB

    t2d = t.astype(jnp.int32).reshape(B, 1)
    if B_pad != B:
        t2d = jnp.pad(t2d, ((0, B_pad - B), (0, 0)))            # index 0 pad rows

    grid = (B_pad // TB,)

    flops = 2 * B_pad * (T * d_model + d_model * dim + dim * dim)
    bytes_accessed = (t2d.size * 4 + table_bf16.size * 2 + w1_bf16.size * 2
                      + w2_bf16.size * 2 + b1.size * 4 + b2.size * 4
                      + B_pad * dim * 4)

    out = pl.pallas_call(
        _time_embedding_kernel,
        out_shape=jax.ShapeDtypeStruct((B_pad, dim), jnp.float32),
        grid=grid,
        in_specs=[
            pl.BlockSpec((TB, 1), lambda i: (i, 0)),            # t (per tile)
            pl.BlockSpec((T, d_model), lambda i: (0, 0)),       # table (resident)
            pl.BlockSpec((d_model, dim), lambda i: (0, 0)),     # W1 (resident)
            pl.BlockSpec((1, dim), lambda i: (0, 0)),           # b1
            pl.BlockSpec((dim, dim), lambda i: (0, 0)),         # W2 (resident)
            pl.BlockSpec((1, dim), lambda i: (0, 0)),           # b2
        ],
        out_specs=pl.BlockSpec((TB, dim), lambda i: (i, 0)),
        compiler_params=pltpu.CompilerParams(
            dimension_semantics=("parallel",),                  # megacore on v7x
        ),
        cost_estimate=pl.CostEstimate(
            flops=flops,
            transcendentals=B_pad * dim,
            bytes_accessed=bytes_accessed,
        ),
    )(t2d, table_bf16, w1_bf16, b1, w2_bf16, b2)

    return out[:B] if B_pad != B else out


# ---------------------------------------------------------------------------
# Parameter construction (deterministic, mirrors the PyTorch __init__).
# ---------------------------------------------------------------------------
def make_sinusoidal_table(T, d_model):
    assert d_model % 2 == 0
    half = jnp.arange(0, d_model, 2, dtype=jnp.float32) / d_model * math.log(10000.0)
    inv_freq = jnp.exp(-half)                                   # [d_model//2]
    pos = jnp.arange(T, dtype=jnp.float32)                      # [T]
    ang = pos[:, None] * inv_freq[None, :]                      # [T, d_model//2]
    emb = jnp.stack([jnp.sin(ang), jnp.cos(ang)], axis=-1)      # [T, d_model//2, 2]
    return emb.reshape(T, d_model)                              # interleaved sin/cos


def xavier_uniform(key, fan_in, fan_out):
    a = math.sqrt(6.0 / (fan_in + fan_out))
    return jax.random.uniform(key, (fan_in, fan_out), jnp.float32, -a, a)


class TimeEmbeddingPallas:
    def __init__(self, T, d_model, dim, key):
        k1, k2 = jax.random.split(key)
        self.table = make_sinusoidal_table(T, d_model)          # f32 [T, d_model]
        self.w1 = xavier_uniform(k1, d_model, dim)              # [d_model, dim]
        self.b1 = jnp.zeros((1, dim), jnp.float32)
        self.w2 = xavier_uniform(k2, dim, dim)                  # [dim, dim]
        self.b2 = jnp.zeros((1, dim), jnp.float32)
        # bf16 copies for the MXU datapath (f32 accumulation in-kernel).
        self.table_bf16 = self.table.astype(jnp.bfloat16)
        self.w1_bf16 = self.w1.astype(jnp.bfloat16)
        self.w2_bf16 = self.w2.astype(jnp.bfloat16)

    def __call__(self, t):
        return time_embedding_forward(t, self.table_bf16, self.w1_bf16,
                                      self.b1, self.w2_bf16, self.b2)


if __name__ == "__main__":
    # Small but lane-dense shapes (feature dims = 128 -> full-vreg stores).
    T, d_model, dim = 64, 128, 128
    B = 8

    key = jax.random.PRNGKey(0)
    kparam, kt = jax.random.split(key)

    mod = TimeEmbeddingPallas(T, d_model, dim, kparam)
    t = jax.random.randint(kt, (B,), 0, T, dtype=jnp.int32)

    out = jax.block_until_ready(mod(t))
    assert out.shape == (B, dim)

    # Reference 1 (semantic check): exact f32 PyTorch-style forward.
    # Loose tolerance accounts for bf16 MXU operands in the kernel.
    x32 = jnp.take(mod.table, t, axis=0)
    h32 = x32 @ mod.w1 + mod.b1
    h32 = h32 * jax.nn.sigmoid(h32)
    ref32 = h32 @ mod.w2 + mod.b2
    assert jnp.allclose(out, ref32, atol=5e-2, rtol=5e-2)

    # Reference 2 (numerics check): mirror the kernel's bf16-operand /
    # f32-accumulate computation in plain JAX.
    xbf = jnp.take(mod.table_bf16, t, axis=0)
    hbf = jnp.dot(xbf, mod.w1_bf16, preferred_element_type=jnp.float32) + mod.b1
    hbf = hbf * jax.nn.sigmoid(hbf)
    refbf = jnp.dot(hbf.astype(jnp.bfloat16), mod.w2_bf16,
                    preferred_element_type=jnp.float32) + mod.b2
    assert jnp.allclose(out, refbf, atol=5e-3, rtol=5e-3)

    print("KERNEL_OK")
</pallas_src>

<mosaic_0001>
module attributes {stable_mosaic.version = 11 : i64} {
  func.func @_time_embedding_kernel(%arg0: i32, %arg1: memref<8x1xi32, #tpu.memory_space<vmem>>, %arg2: memref<64x128xbf16, #tpu.memory_space<vmem>>, %arg3: memref<128x128xbf16, #tpu.memory_space<vmem>>, %arg4: memref<1x128xf32, #tpu.memory_space<vmem>>, %arg5: memref<128x128xbf16, #tpu.memory_space<vmem>>, %arg6: memref<1x128xf32, #tpu.memory_space<vmem>>, %arg7: memref<8x128xf32, #tpu.memory_space<vmem>>) attributes {dimension_semantics = [#tpu.dimension_semantics<parallel>], iteration_bounds = array<i64: 1>, scalar_prefetch = 0 : i64, scratch_operands = 0 : i64, tpu.core_type = #tpu.core_type<tc>, window_params = [{transform_indices = @transform_0, window_bounds = array<i64: 8, 1>}, {pipeline_mode = #tpu.pipeline_mode<synchronous>, transform_indices = @transform_1, window_bounds = array<i64: 64, 128>}, {pipeline_mode = #tpu.pipeline_mode<synchronous>, transform_indices = @transform_2, window_bounds = array<i64: 128, 128>}, {pipeline_mode = #tpu.pipeline_mode<synchronous>, transform_indices = @transform_3, window_bounds = array<i64: 1, 128>}, {pipeline_mode = #tpu.pipeline_mode<synchronous>, transform_indices = @transform_4, window_bounds = array<i64: 128, 128>}, {pipeline_mode = #tpu.pipeline_mode<synchronous>, transform_indices = @transform_5, window_bounds = array<i64: 1, 128>}, {transform_indices = @transform_6, window_bounds = array<i64: 8, 128>}]} {
    %c0 = arith.constant 0 : index
    %c0_0 = arith.constant 0 : index
    %0 = vector.load %arg1[%c0, %c0_0] : memref<8x1xi32, #tpu.memory_space<vmem>>, vector<8x1xi32>
    %1 = tpu.iota {dimensions = array<i32: 1>} : vector<8x64xi32>
    %2 = vector.broadcast %0 : vector<8x1xi32> to vector<8x64xi32>
    %3 = arith.cmpi eq, %2, %1 : vector<8x64xi32>
    %4 = arith.extui %3 : vector<8x64xi1> to vector<8x64xi32>
    %5 = arith.sitofp %4 : vector<8x64xi32> to vector<8x64xf32>
    %6 = arith.truncf %5 : vector<8x64xf32> to vector<8x64xbf16>
    %c0_1 = arith.constant 0 : index
    %c0_2 = arith.constant 0 : index
    %7 = vector.load %arg2[%c0_1, %c0_2] : memref<64x128xbf16, #tpu.memory_space<vmem>>, vector<64x128xbf16>
    %cst = arith.constant dense<0.000000e+00> : vector<8x128xf32>
    %8 = tpu.matmul %6, %7, %cst {dimension_numbers = #tpu.dot_dimension_numbers<[1], [0], [0], [1], [0, 0, 1, 1], [], []>} : vector<8x64xbf16>, vector<64x128xbf16>, vector<8x128xf32> -> vector<8x128xf32>
    %9 = arith.truncf %8 : vector<8x128xf32> to vector<8x128xbf16>
    %c0_3 = arith.constant 0 : index
    %c0_4 = arith.constant 0 : index
    %10 = vector.load %arg3[%c0_3, %c0_4] : memref<128x128xbf16, #tpu.memory_space<vmem>>, vector<128x128xbf16>
    %cst_5 = arith.constant dense<0.000000e+00> : vector<8x128xf32>
    %11 = tpu.matmul %9, %10, %cst_5 {dimension_numbers = #tpu.dot_dimension_numbers<[1], [0], [0], [1], [0, 0, 1, 1], [], []>} : vector<8x128xbf16>, vector<128x128xbf16>, vector<8x128xf32> -> vector<8x128xf32>
    %c0_6 = arith.constant 0 : index
    %c0_7 = arith.constant 0 : index
    %12 = vector.load %arg4[%c0_6, %c0_7] : memref<1x128xf32, #tpu.memory_space<vmem>>, vector<1x128xf32>
    %13 = vector.broadcast %12 : vector<1x128xf32> to vector<8x128xf32>
    %14 = arith.addf %11, %13 : vector<8x128xf32>
    %15 = arith.negf %14 : vector<8x128xf32>
    %16 = math.exp %15 : vector<8x128xf32>
    %cst_8 = arith.constant 1.000000e+00 : f32
    %17 = vector.broadcast %cst_8 : f32 to vector<8x128xf32>
    %18 = arith.addf %17, %16 : vector<8x128xf32>
    %19 = arith.divf %17, %18 : vector<8x128xf32>
    %20 = arith.mulf %14, %19 : vector<8x128xf32>
    %21 = arith.truncf %20 : vector<8x128xf32> to vector<8x128xbf16>
    %c0_9 = arith.constant 0 : index
    %c0_10 = arith.constant 0 : index
    %22 = vector.load %arg5[%c0_9, %c0_10] : memref<128x128xbf16, #tpu.memory_space<vmem>>, vector<128x128xbf16>
    %cst_11 = arith.constant dense<0.000000e+00> : vector<8x128xf32>
    %23 = tpu.matmul %21, %22, %cst_11 {dimension_numbers = #tpu.dot_dimension_numbers<[1], [0], [0], [1], [0, 0, 1, 1], [], []>} : vector<8x128xbf16>, vector<128x128xbf16>, vector<8x128xf32> -> vector<8x128xf32>
    %c0_12 = arith.constant 0 : index
    %c0_13 = arith.constant 0 : index
    %24 = vector.load %arg6[%c0_12, %c0_13] : memref<1x128xf32, #tpu.memory_space<vmem>>, vector<1x128xf32>
    %25 = vector.broadcast %24 : vector<1x128xf32> to vector<8x128xf32>
    %26 = arith.addf %23, %25 : vector<8x128xf32>
    %c0_14 = arith.constant 0 : index
    %c0_15 = arith.constant 0 : index
    %27 = vector.load %arg7[%c0_14, %c0_15] : memref<8x128xf32, #tpu.memory_space<vmem>>, vector<8x128xf32>
    tpu.vector_store %arg7[%c0_14, %c0_15], %26 {strides = array<i32>} : memref<8x128xf32, #tpu.memory_space<vmem>>, vector<8x128xf32>,
    return
  }
  func.func @transform_0(%arg0: i32) -> (i32, i32) {
    %c0_i32 = arith.constant 0 : i32
    %c0_i32_0 = arith.constant 0 : i32
    return %arg0, %c0_i32 : i32, i32
  }
  func.func @transform_1(%arg0: i32) -> (i32, i32) {
    %c0_i32 = arith.constant 0 : i32
    %c0_i32_0 = arith.constant 0 : i32
    %c0_i32_1 = arith.constant 0 : i32
    return %c0_i32, %c0_i32_0 : i32, i32
  }
  func.func @transform_2(%arg0: i32) -> (i32, i32) {
    %c0_i32 = arith.constant 0 : i32
    %c0_i32_0 = arith.constant 0 : i32
    %c0_i32_1 = arith.constant 0 : i32
    return %c0_i32, %c0_i32_0 : i32, i32
  }
  func.func @transform_3(%arg0: i32) -> (i32, i32) {
    %c0_i32 = arith.constant 0 : i32
    %c0_i32_0 = arith.constant 0 : i32
    %c0_i32_1 = arith.constant 0 : i32
    return %c0_i32, %c0_i32_0 : i32, i32
  }
  func.func @transform_4(%arg0: i32) -> (i32, i32) {
    %c0_i32 = arith.constant 0 : i32
    %c0_i32_0 = arith.constant 0 : i32
    %c0_i32_1 = arith.constant 0 : i32
    return %c0_i32, %c0_i32_0 : i32, i32
  }
  func.func @transform_5(%arg0: i32) -> (i32, i32) {
    %c0_i32 = arith.constant 0 : i32
    %c0_i32_0 = arith.constant 0 : i32
    %c0_i32_1 = arith.constant 0 : i32
    return %c0_i32, %c0_i32_0 : i32, i32
  }
  func.func @transform_6(%arg0: i32) -> (i32, i32) {
    %c0_i32 = arith.constant 0 : i32
    %c0_i32_0 = arith.constant 0 : i32
    return %arg0, %c0_i32 : i32, i32
  }
}

</mosaic_0001>

<bundles_post_ra>
// kernel: tpu_custom_call.1
= control target key start
LH: loop header
LB: loop body
LE: loop exit
PB: predicated region body
PF: predicated region fallthrough
CT: control target
= control target key end

     0   :  { %11 = vsyncpa [#allocation3], 0  ;;  %s772_s0 = inlined_call_operand.vmem [shape: s32[8,1], index: 0, kind: input, shape index: {}]   ;;  %s773_s1 = inlined_call_operand.hbm [shape: bf16[64,128], index: 1, kind: input, shape index: {}]   ;;  %s774_s2 = inlined_call_operand.hbm [shape: bf16[128,128], index: 2, kind: input, shape index: {}]   ;;  %s775_s3 = inlined_call_operand.vmem [shape: f32[1,128], index: 3, kind: input, shape index: {}]   ;;  %s776_s4 = inlined_call_operand.hbm [shape: bf16[128,128], index: 4, kind: input, shape index: {}]   ;;  %s777_s5 = inlined_call_operand.vmem [shape: f32[1,128], index: 5, kind: input, shape index: {}]   ;;  %s778_s6 = inlined_call_operand.hbm [shape: f32[8,128], index: 6, kind: output, shape index: {}]  }
   0x1   :  { %12 = vsyncpa [#allocation6], 0 }
   0x2   :  { %13 = vsyncpa [#allocation4], 0  ;;  %s628_s21 = smov [#allocation5]   ;;  %s629_s23 = smov [#allocation2]  }
   0x3   :  { %s33_s22 = sshll.u32 %s628_s21, 4  ;;  %s21_s24 = sshll.u32 %s629_s23, 4  ;;  %s34_s22 = int_to_ptr.vmem [resolvable:$true] %s33_s22  ;;  %s672_s24 = int_to_ptr.vmem [resolvable:$true] %s21_s24 }
   0x4   :  { %s534_s27 = scalar_lea.hbm %s774_s2, 1024 }
   0x5   :  { %p535_p0 = scmp.ne.s32.totalorder %s774_s2, %s534_s27  ;;  %p538_p1 = scmp.lt.u32.totalorder %s534_s27, %s774_s2 }
   0x7   :  { %p540_p2 = pnand %p538_p1, %p535_p0 }
   0x9   :  { %543 = shalt.err (!%p540_p2)
}
   0xa   :  { %s544_s8 = scalar_lea.vmem %s34_s22, 1024  ;;  %p549_p4 = scmp.lt.s32.totalorder %s34_s22, %s34_s22 }
   0xb   :  { %p545_p3 = scmp.ne.s32.totalorder %s34_s22, %s544_s8  ;;  %p550_p5 = scmp.lt.s32.totalorder %s544_s8, %s544_s8 }
   0xd   :  { %p551_p6 = por %p550_p5, %p549_p4 }
   0xf   :  { %p552_p7 = pnand %p551_p6, %p545_p3 }
  0x11   :  { %555 = shalt.err (!%p552_p7)
}
  0x12   :  { %s630_s9 = smov 64   ;;  %s631_s10 = smov 4  }
  0x13   :  { %39 = dma.hbm_to_vmem [thread:$0]  %s774_s2, 1024, %s34_s22, [#allocation6], %s630_s9, %s630_s9, %s631_s10  }
  0x14   :  { %s556_s15 = scalar_lea.hbm %s773_s1, 512 }
  0x15   :  { %p557_p8 = scmp.ne.s32.totalorder %s773_s1, %s556_s15  ;;  %p560_p9 = scmp.lt.u32.totalorder %s556_s15, %s773_s1 }
  0x17   :  { %p562_p10 = pnand %p560_p9, %p557_p8 }
  0x19   :  { %565 = shalt.err (!%p562_p10)
}
  0x1a   :  { %s566_s20 = scalar_lea.vmem %s672_s24, 512  ;;  %p571_p12 = scmp.lt.s32.totalorder %s672_s24, %s672_s24 }
  0x1b   :  { %p567_p11 = scmp.ne.s32.totalorder %s672_s24, %s566_s20  ;;  %p572_p13 = scmp.lt.s32.totalorder %s566_s20, %s566_s20 }
  0x1d   :  { %p573_p0 = por %p572_p13, %p571_p12 }
  0x1f   :  { %p574_p1 = pnand %p573_p0, %p567_p11 }
  0x21   :  { %577 = shalt.err (!%p574_p1)
}
  0x22   :  { %27 = dma.hbm_to_vmem [thread:$0]  %s773_s1, 512, %s672_s24, [#allocation3], %s630_s9, %s630_s9, %s631_s10  }
  0x23   :  { %s632_s22 = smov [#allocation7]   ;;  %s578_s27 = scalar_lea.hbm %s776_s4, 1024 }
  0x24   :  { %s47_s23 = sshll.u32 %s632_s22, 4  ;;  %p579_p2 = scmp.ne.s32.totalorder %s776_s4, %s578_s27  ;;  %s48_s23 = int_to_ptr.vmem [resolvable:$true] %s47_s23 }
  0x25   :  { %p582_p3 = scmp.lt.u32.totalorder %s578_s27, %s776_s4 }
  0x27   :  { %p584_p4 = pnand %p582_p3, %p579_p2 }
  0x29   :  { %587 = shalt.err (!%p584_p4)
}
  0x2a   :  { %s588_s8 = scalar_lea.vmem %s48_s23, 1024  ;;  %p593_p6 = scmp.lt.s32.totalorder %s48_s23, %s48_s23 }
  0x2b   :  { %p589_p5 = scmp.ne.s32.totalorder %s48_s23, %s588_s8  ;;  %p594_p7 = scmp.lt.s32.totalorder %s588_s8, %s588_s8 }
  0x2d   :  { %p595_p8 = por %p594_p7, %p593_p6 }
  0x2f   :  { %p596_p9 = pnand %p595_p8, %p589_p5 }
  0x31   :  { %599 = shalt.err (!%p596_p9)
}
  0x32   :  { %53 = dma.hbm_to_vmem [thread:$0]  %s776_s4, 1024, %s48_s23, [#allocation6], %s630_s9, %s630_s9, %s631_s10  }
  0x33   :  { %622 = dma.done.wait [#allocation3], 512  }
  0x34   :  { %623 = vsyncadd [#allocation3], 4294966784 }
  0x35   :  { %624 = dma.done.wait [#allocation6], 2048  }
  0x36   :  { %625 = vsyncadd [#allocation6], 4294965248  ;;  %v633_v0 = vmov 0   ;;  %v634_v1 = vmov 0.0   ;;  %v66_v2 = vld [vmem:[%s772_s0] sm:$0xff]  ;;  %v511_v4 = vld [vmem:[#allocation2 + $0x8] sm:$0xff]   ;;  %v67_v14 = vlaneseq }
  0x37   :  { %509 = vset.pattern.permute.xlu0 %v633_v0  ;;  %448 = vmatprep.subr.bf16.mxu0 %v634_v1  ;;  %v510_v3 = vld [vmem:[#allocation2] sm:$0xff]   ;;  %vm635_vm0 = vmmov 0   ;;  %v512_v6 = vld [vmem:[#allocation2 + $0x10] sm:$0xff]   ;;  %v515_v7 = vld [vmem:[#allocation5 + $0x8] sm:$0xff]   ;;  %vm108_vm2 = vcmask 523264   ;;  %s636_s13 = smov [#allocation8]  }
  0x38   :  { %460 = vmatprep.subr.bf16.mxu1 %v634_v1  ;;  %70 = vperm.xlu0 %509, %v66_v2   ;;  %v514_v5 = vld [vmem:[#allocation5] sm:$0xff]   ;;  %v513_v8 = vld [vmem:[#allocation2 + $0x18] sm:$0xff]   ;;  %v516_v9 = vld [vmem:[#allocation5 + $0x10] sm:$0xff]   ;;  %v68_v15 = vand.u32 127, %v67_v14 }
  0x39   :  { %449 = vmatpush3.bf16.msra.mxu0 %v510_v3  ;;  %456 = vmatprep.mubr.msk.bf16.mxu0 %vm635_vm0, %v634_v1  ;;  %v517_v10 = vld [vmem:[#allocation5 + $0x18] sm:$0xff]   ;;  %v518_v11 = vld [vmem:[#allocation5 + $0x20] sm:$0xff]   ;;  %v519_v12 = vld [vmem:[#allocation5 + $0x28] sm:$0xff]  }
  0x3a   :  { %450 = vmatprep.subr.bf16.mxu0 %v634_v1  ;;  %476 = vmatprep.mubr.msk.bf16.mxu1 %vm635_vm0, %v634_v1  ;;  %v520_v13 = vld [vmem:[#allocation5 + $0x30] sm:$0xff]   ;;  %v521_v19 = vld [vmem:[#allocation5 + $0x38] sm:$0xff]   ;;  %v522_v25 = vld [vmem:[#allocation7] sm:$0xff]  }
  0x3b   :  { %461 = vmatpush3.bf16.msra.mxu1 %v514_v5  ;;  %v523_v26 = vld [vmem:[#allocation7 + $0x8] sm:$0xff]   ;;  %v524_v27 = vld [vmem:[#allocation7 + $0x10] sm:$0xff]   ;;  %v525_v28 = vld [vmem:[#allocation7 + $0x18] sm:$0xff]  }
  0x3c   :  { %462 = vmatprep.subr.bf16.mxu1 %v634_v1  ;;  %v526_v29 = vld [vmem:[#allocation7 + $0x20] sm:$0xff]   ;;  %v527_v30 = vld [vmem:[#allocation7 + $0x28] sm:$0xff]   ;;  %v528_v31 = vld [vmem:[#allocation7 + $0x30] sm:$0xff]  }
  0x3d   :  { %451 = vmatpush3.bf16.msra.mxu0 %v511_v4  ;;  %v529_v32 = vld [vmem:[#allocation7 + $0x38] sm:$0xff]   ;;  %v406_v33 = vld [vmem:[%s775_s3] ss:$0 sm:$0xff]  ;;  %s390_s3 = sshll.u32 %s636_s13, 4  ;;  %s391_s3 = int_to_ptr.vmem [resolvable:$true] %s390_s3 }
  0x3e   :  { %452 = vmatprep.subr.bf16.mxu0 %v634_v1  ;;  %v416_v45 = vld [vmem:[%s777_s5] ss:$0 sm:$0xff]  ;;  %s600_s14 = scalar_lea.vmem %s391_s3, 128  ;;  %p605_p11 = scmp.lt.s32.totalorder %s391_s3, %s391_s3 }
  0x3f   :  { %463 = vmatpush3.bf16.msra.mxu1 %v515_v7  ;;  %p601_p10 = scmp.ne.s32.totalorder %s391_s3, %s600_s14  ;;  %p606_p12 = scmp.lt.s32.totalorder %s600_s14, %s600_s14 }
  0x40   :  { %464 = vmatprep.subr.bf16.mxu1 %v634_v1 }
  0x41   :  { %453 = vmatpush3.bf16.msra.mxu0 %v512_v6  ;;  %p607_p13 = por %p606_p12, %p605_p11 }
  0x42   :  { %454 = vmatprep.subr.bf16.mxu0 %v634_v1 }
  0x43   :  { %465 = vmatpush3.bf16.msra.mxu1 %v516_v9  ;;  %p608_p0 = pnand %p607_p13, %p601_p10 }
  0x44   :  { %466 = vmatprep.subr.bf16.mxu1 %v634_v1 }
  0x45   :  { %455 = vmatpush3.bf16.msra.mxu0 %v513_v8 }
  0x46   :  { %480 = vmatprep.subr.bf16.mxu0 %v634_v1 }
  0x47   :  { %467 = vmatpush3.bf16.msra.mxu1 %v517_v10 }
  0x48   :  { %468 = vmatprep.subr.bf16.mxu1 %v634_v1 }
  0x4b   :  { %469 = vmatpush3.bf16.msra.mxu1 %v518_v11 }
  0x4c   :  { %470 = vmatprep.subr.bf16.mxu1 %v634_v1 }
  0x4f   :  { %471 = vmatpush3.bf16.msra.mxu1 %v519_v12 }
  0x50   :  { %472 = vmatprep.subr.bf16.mxu1 %v634_v1 }
  0x53   :  { %473 = vmatpush3.bf16.msra.mxu1 %v520_v13 }
  0x54   :  { %474 = vmatprep.subr.bf16.mxu1 %v634_v1 }
  0x57   :  { %475 = vmatpush3.bf16.msra.mxu1 %v521_v19 }
  0xb7   :  { %v71_v16 = vpop.permute.xlu0 %70 }
  0xb8   :  { %vm72_vm1 = vcmp.eq.s32.totalorder %v71_v16, %v68_v15 }
  0xb9   :  { %v400_v17 = vsel %vm72_vm1, 1.0, %v634_v1 }
  0xba   :  { %v75_v18 = vpack.c.bf16 %v400_v17, %v400_v17 }
  0xbc   :  { %457 = vmatmul.mubr.msk.bf16.vlgmr.msra.gmra.mrb[0].mxu0 %vm108_vm2, %v75_v18 }
  0xbd   :  { %496 = vmatprep.mubr.msk.bf16.mxu0 %vm635_vm0, %v634_v1  ;;  %481 = vmatpush3.bf16.msra.mxu0 %v522_v25 }
  0xbe   :  { %482 = vmatprep.subr.bf16.mxu0 %v634_v1 }
  0xc1   :  { %483 = vmatpush3.bf16.msra.mxu0 %v523_v26 }
  0xc2   :  { %484 = vmatprep.subr.bf16.mxu0 %v634_v1 }
  0xc5   :  { %485 = vmatpush3.bf16.msra.mxu0 %v524_v27 }
  0xc6   :  { %486 = vmatprep.subr.bf16.mxu0 %v634_v1 }
  0xc9   :  { %487 = vmatpush3.bf16.msra.mxu0 %v525_v28 }
  0xca   :  { %488 = vmatprep.subr.bf16.mxu0 %v634_v1 }
  0xcd   :  { %489 = vmatpush3.bf16.msra.mxu0 %v526_v29 }
  0xce   :  { %490 = vmatprep.subr.bf16.mxu0 %v634_v1 }
  0xd1   :  { %491 = vmatpush3.bf16.msra.mxu0 %v527_v30 }
  0xd2   :  { %492 = vmatprep.subr.bf16.mxu0 %v634_v1 }
  0xd5   :  { %493 = vmatpush3.bf16.msra.mxu0 %v528_v31 }
  0xd6   :  { %494 = vmatprep.subr.bf16.mxu0 %v634_v1 }
  0xd9   :  { %495 = vmatpush3.bf16.msra.mxu0 %v529_v32 }
 0x18f   :  { %v146_v20 = vpop.f32.mrb[0].mxu0 }
 0x190   :  { %v152_v21 = vpack.c.bf16 %v146_v20, %v146_v20  ;;  %v458_v22 = vpop.f32.mrb[1].mxu0 }
 0x191   :  { %v149_v23 = vpop.f32.mrb[2].mxu0 }
 0x192   :  { %v459_v24 = vpop.f32.mrb[3].mxu0  ;;  %477 = vmatmul.mubr.bf16.vlgmr.msra.gmra.mrb[0].mxu1 %v152_v21 }
 0x265   :  { %v258_v34 = vpop.f32.mrb[0].mxu1 }
 0x266   :  { %v259_v35 = vadd.f32 %v406_v33, %v258_v34  ;;  %v478_v36 = vpop.f32.mrb[1].mxu1 }
 0x267   :  { %v261_v37 = vpop.f32.mrb[2].mxu1 }
 0x268   :  { %v415_v38 = vmul.f32 -1.442695, %v259_v35  ;;  %v479_v39 = vpop.f32.mrb[3].mxu1 }
 0x26a   :  { %530 = vpow2.f32 %v415_v38 }
 0x274   :  { %v531_v40 = vpop.eup %530 }
 0x275   :  { %v267_v41 = vadd.f32 1.0, %v531_v40 }
 0x277   :  { %532 = vrcp.f32 %v267_v41 }
 0x281   :  { %v533_v42 = vpop.eup %532 }
 0x282   :  { %v270_v43 = vmul.f32 %v533_v42, %v259_v35 }
 0x284   :  { %v271_v44 = vpack.c.bf16 %v270_v43, %v270_v43 }
 0x286   :  { %497 = vmatmul.mubr.bf16.vlgmr.msra.gmra.mrb[4].mxu0 %v271_v44 }
 0x359   :  { %v377_v46 = vpop.f32.mrb[4].mxu0 }
 0x35a   :  { %v378_v47 = vadd.f32 %v416_v45, %v377_v46  ;;  %v498_v48 = vpop.f32.mrb[5].mxu0 }
 0x35b   :  { %v380_v49 = vpop.f32.mrb[6].mxu0 }
 0x35c   :  { %383 = vst [vmem:[#allocation8] sm:$0xff] %v378_v47  ;;  %v499_v50 = vpop.f32.mrb[7].mxu0 }
 0x35d   :  { %611 = shalt.err (!%p608_p0)
}
 0x35e   :  { %s612_s5 = scalar_lea.hbm %s778_s6, 128 }
 0x35f   :  { %p613_p1 = scmp.ne.s32.totalorder %s778_s6, %s612_s5  ;;  %p616_p2 = scmp.lt.u32.totalorder %s612_s5, %s778_s6 }
 0x361   :  { %p618_p3 = pnand %p616_p2, %p613_p1 }
 0x363   :  { %621 = shalt.err (!%p618_p3)
}
 0x364   :  { %393 = dma.vmem_to_hbm [thread:$0]  %s391_s3, 128, %s778_s6, [#allocation4]  }
 0x365   :  { %626 = dma.done.wait [#allocation4], 128  }
 0x366   :  { %627 = vsyncadd [#allocation4], 4294967168 }
 0x367   :  { %397 = vsyncpa [#allocation3], 1 }
 0x368   :  { %398 = vsyncpa [#allocation6], 1 }
 0x369   :  { %399 = vsyncpa [#allocation4], 1 }

</bundles_post_ra>
